<compile_context>
chip_gen: v7x
topology: tpu7x:2x2x1
jax: 0.10.0
libtpu: 0.0.40
codegen_flags: <defaults>
</compile_context>

<pallas_src>
import jax
import jax.numpy as jnp
from jax import lax
from jax.experimental import pallas as pl
from jax.experimental.pallas import tpu as pltpu


def _round_up(x, m):
    return (x + m - 1) // m * m


def _choose_query_tile(n, c):
    """Pick (tq, n_padded): tq a multiple of 16 (bf16 sublane packing), padded N a
    multiple of tq, per-step working set kept under ~40 MiB (fits v7x VMEM)."""
    if n <= 512:
        npad = _round_up(n, 16)
        return npad, npad                      # single query tile per batch
    tq = 256                                   # fills the 256-wide MXU M dim (v6e/v7x)
    budget = 40 * 1024 * 1024
    while tq > 16:
        npad = _round_up(n, tq)
        work = 3 * tq * npad * 4 + 2 * npad * c * 2
        if work <= budget:
            break
        tq //= 2
    return tq, _round_up(n, tq)


def self_attention_pallas(x_nchw, wq, bq, wk, bk, wv, bv, *, tq=None):
    """x_nchw: (B, C, H, W) f32.  Weights PyTorch 1x1-conv style: wq/wk (C//8, C), wv (C, C)."""
    B, C, H, W = x_nchw.shape
    N = H * W
    inv_scale = 1.0 / (float(N) ** 0.5)

    wq = jnp.asarray(wq, jnp.float32)
    bq = jnp.asarray(bq, jnp.float32)
    wk = jnp.asarray(wk, jnp.float32)
    wv = jnp.asarray(wv, jnp.float32)
    bv = jnp.asarray(bv, jnp.float32)
    # NOTE: bk (and the bq^T bk constant) only add query-row-constant energy terms
    # -> dropped (softmax shift-invariance per row).

    # Glue: NCHW -> (B, N, C) pixel rows (f32 for the bias precompute).
    x_bnc = jnp.transpose(x_nchw.reshape(B, C, N), (0, 2, 1)).astype(jnp.float32)

    # Fused q/k weight (scale folded) and per-key bias.
    a_qk = ((wq.T @ wk) * inv_scale).astype(jnp.bfloat16)            # (C, C)
    bvec = (x_bnc @ (wk.T @ bq)) * inv_scale                         # (B, N) f32
    wv_t = wv.T.astype(jnp.bfloat16)                                  # (C, C)
    bv2 = bv.reshape(1, C)                                            # (1, C) f32

    # Tile / pad the pixel axis.
    if tq is None:
        tq, Np = _choose_query_tile(N, C)
    else:
        tq = max(16, _round_up(int(tq), 16))
        tq = min(tq, _round_up(N, 16))
        Np = _round_up(N, tq)
    pad = Np - N

    x_bf = x_bnc.astype(jnp.bfloat16)                                 # pre-cast once
    if pad:
        x_bf = jnp.pad(x_bf, ((0, 0), (0, pad), (0, 0)))
        # padded keys get -inf-ish energy -> zero probability after softmax
        bvec = jnp.pad(bvec, ((0, 0), (0, pad)), constant_values=-1e30)
    bvec = bvec.reshape(B, 1, Np)

    # Explicit VMEM budget (bytes), with headroom.  Temporaries dominate.
    est_bytes = (
        2 * Np * C * 2            # resident bf16 x block (double-buffered worst case)
        + 2 * Np * 4              # per-key bias block
        + 2 * tq * C * 4          # output tile (double-buffered)
        + 2 * 2 * C * C * 2       # A, Wv^T (bf16, double-buffered)
        + 2 * C * 4               # bv
        + 3 * tq * Np * 4         # energy / p f32 temporaries
        + tq * Np * 2             # p bf16 copy
        + 4 * tq * C * 4          # qa / ax temporaries
    )
    vmem_limit = int(min(max(est_bytes * 3 // 2, 32 * 1024 * 1024),
                         100 * 1024 * 1024))

    def kernel(bvec_ref, xf_ref, a_ref, wvt_ref, bv_ref, o_ref):
        # bvec_ref : (1, 1, Np) f32   per-key bias (+ pad mask)
        # xf_ref   : (1, Np, C) bf16  full x for this batch (keys/values + queries)
        # a_ref    : (C, C)     bf16  Wq^T Wk / sqrt(N)
        # wvt_ref  : (C, C)     bf16  Wv^T
        # bv_ref   : (1, C)     f32
        # o_ref    : (1, tq, C) f32
        row0 = pl.multiple_of(pl.program_id(1) * tq, tq)
        xf = xf_ref[0]                                             # (Np, C) bf16
        xq = xf_ref[0, pl.ds(row0, tq), :]                         # (tq, C) bf16, sliced in VMEM

        # Fused query-side projection (scale + key-side bias handled elsewhere).
        qa = jnp.dot(xq, a_ref[...], preferred_element_type=jnp.float32)     # (tq, C)

        # energy tile (tq, Np): contract last dims (transpose-free), bf16 MXU, f32 acc.
        energy = lax.dot_general(
            qa.astype(jnp.bfloat16), xf,
            (((1,), (1,)), ((), ())),
            preferred_element_type=jnp.float32)                               # (tq, Np)
        energy = energy + bvec_ref[0]                                          # per-key bias / pad mask

        # Numerically stable softmax over keys; normalization deferred past the
        # attn@x matmul (O(tq*C) scale instead of O(tq*Np)).
        m = jnp.max(energy, axis=-1, keepdims=True)
        p = jnp.exp(energy - m)                                                # unnormalized probs
        inv = pl.reciprocal(jnp.sum(p, axis=-1, keepdims=True), approx=True)   # EUP slot

        ax = jnp.dot(p.astype(jnp.bfloat16), xf,
                     preferred_element_type=jnp.float32)                       # (tq, C)
        ax = ax * inv

        # Value projection + bias applied after attention.
        o_ref[0] = (jnp.dot(ax.astype(jnp.bfloat16), wvt_ref[...],
                            preferred_element_type=jnp.float32)
                    + bv_ref[...])

    out_pad = pl.pallas_call(
        kernel,
        out_shape=jax.ShapeDtypeStruct((B, Np, C), jnp.float32),
        grid_spec=pltpu.PrefetchScalarGridSpec(
            num_scalar_prefetch=0,
            grid=(B, Np // tq),
            in_specs=[
                pl.BlockSpec((1, 1, Np), lambda b, q: (b, 0, 0)),   # per-key bias
                pl.BlockSpec((1, Np, C), lambda b, q: (b, 0, 0)),   # full x (resident per batch)
                pl.BlockSpec((C, C), lambda b, q: (0, 0)),          # A = Wq^T Wk / sqrt(N)
                pl.BlockSpec((C, C), lambda b, q: (0, 0)),          # Wv^T
                pl.BlockSpec((1, C), lambda b, q: (0, 0)),          # bv
            ],
            out_specs=pl.BlockSpec((1, tq, C), lambda b, q: (b, q, 0)),
        ),
        compiler_params=pltpu.CompilerParams(
            dimension_semantics=("parallel", "parallel"),
            vmem_limit_bytes=vmem_limit,
        ),
    )(bvec, x_bf, a_qk, wv_t, bv2)

    out_bnc = out_pad[:, :N, :]
    # PyTorch does a raw `.view(B, C, H, W)` on the contiguous (B, N, C) bmm
    # result (no transpose back); reproduce with a plain row-major reshape.
    return out_bnc.reshape(B, C, H, W)


def _reference(x_nchw, wq, bq, wk, bk, wv, bv):
    B, C, H, W = x_nchw.shape
    N = H * W
    x_bnc = jnp.transpose(x_nchw.reshape(B, C, N), (0, 2, 1))
    q = jnp.einsum("bnc,oc->bno", x_bnc, wq) + bq
    k = jnp.einsum("bnc,oc->bno", x_bnc, wk) + bk
    v = jnp.einsum("bnc,oc->bno", x_bnc, wv) + bv
    energy = jnp.einsum("bno,bmo->bnm", q, k) / (N ** 0.5)
    attn = jax.nn.softmax(energy, axis=-1)
    out = jnp.einsum("bnm,bmc->bnc", attn, v)
    return out.reshape(B, C, H, W)


if __name__ == "__main__":
    key = jax.random.PRNGKey(0)
    B, C, H, W = 2, 16, 8, 8            # in_channels=16 -> query/key channels = 2
    C8 = C // 8

    k_x, k_wq, k_bq, k_wk, k_bk, k_wv, k_bv = jax.random.split(key, 7)
    x = jax.random.normal(k_x, (B, C, H, W), dtype=jnp.float32)

    # deterministic parameter init (1x1 conv weights stored as (out, in))
    s = 1.0 / (C ** 0.5)
    wq = jax.random.uniform(k_wq, (C8, C), jnp.float32, -s, s)
    bq = jax.random.uniform(k_bq, (C8,),   jnp.float32, -s, s)
    wk = jax.random.uniform(k_wk, (C8, C), jnp.float32, -s, s)
    bk = jax.random.uniform(k_bk, (C8,),   jnp.float32, -s, s)
    wv = jax.random.uniform(k_wv, (C, C),  jnp.float32, -s, s)
    bv = jax.random.uniform(k_bv, (C,),    jnp.float32, -s, s)

    # tq=16 exercises the multi-tile query grid (N = 64 -> 4 query tiles).
    out = jax.block_until_ready(self_attention_pallas(x, wq, bq, wk, bk, wv, bv, tq=16))
    ref = jax.block_until_ready(_reference(x, wq, bq, wk, bk, wv, bv))
    assert out.shape == (B, C, H, W)
    # bf16 MXU matmuls + approx reciprocal -> slightly looser tolerance than f32.
    assert jnp.allclose(out, ref, atol=2e-2, rtol=2e-2), "mismatch vs reference (divisible N)"

    # Ragged spatial size exercises the N-padding / masked-key path (N=35 -> Np=48).
    H2, W2 = 5, 7
    x2 = jax.random.normal(jax.random.PRNGKey(1), (1, C, H2, W2), dtype=jnp.float32)
    out2 = jax.block_until_ready(self_attention_pallas(x2, wq, bq, wk, bk, wv, bv, tq=16))
    ref2 = jax.block_until_ready(_reference(x2, wq, bq, wk, bk, wv, bv))
    assert out2.shape == (1, C, H2, W2)
    assert jnp.allclose(out2, ref2, atol=2e-2, rtol=2e-2), "mismatch vs reference (padded N)"

    print("KERNEL_OK")
</pallas_src>

<mosaic_0001>
module attributes {stable_mosaic.version = 11 : i64} {
  func.func @kernel(%arg0: i32, %arg1: i32, %arg2: memref<1x1x64xf32, #tpu.memory_space<vmem>>, %arg3: memref<1x64x16xbf16, #tpu.memory_space<vmem>>, %arg4: memref<16x16xbf16, #tpu.memory_space<vmem>>, %arg5: memref<16x16xbf16, #tpu.memory_space<vmem>>, %arg6: memref<1x16xf32, #tpu.memory_space<vmem>>, %arg7: memref<1x16x16xf32, #tpu.memory_space<vmem>>) attributes {dimension_semantics = [#tpu.dimension_semantics<parallel>, #tpu.dimension_semantics<parallel>], iteration_bounds = array<i64: 2, 4>, scalar_prefetch = 0 : i64, scratch_operands = 0 : i64, tpu.core_type = #tpu.core_type<tc>, window_params = [{transform_indices = @transform_0, window_bounds = array<i64: 1, 1, 64>}, {transform_indices = @transform_1, window_bounds = array<i64: 1, 64, 16>}, {pipeline_mode = #tpu.pipeline_mode<synchronous>, transform_indices = @transform_2, window_bounds = array<i64: 16, 16>}, {pipeline_mode = #tpu.pipeline_mode<synchronous>, transform_indices = @transform_3, window_bounds = array<i64: 16, 16>}, {pipeline_mode = #tpu.pipeline_mode<synchronous>, transform_indices = @transform_4, window_bounds = array<i64: 1, 16>}, {transform_indices = @transform_5, window_bounds = array<i64: 1, 16, 16>}]} {
    %c16_i32 = arith.constant 16 : i32
    %0 = arith.muli %arg1, %c16_i32 : i32
    %1 = tpu.assume_multiple %0, 16 : i32
    %c0 = arith.constant 0 : index
    %c0_0 = arith.constant 0 : index
    %c0_1 = arith.constant 0 : index
    %2 = vector.load %arg3[%c0, %c0_0, %c0_1] : memref<1x64x16xbf16, #tpu.memory_space<vmem>>, vector<1x64x16xbf16>
    %3 = vector.shape_cast %2 : vector<1x64x16xbf16> to vector<64x16xbf16>
    %c0_2 = arith.constant 0 : index
    %4 = arith.index_cast %1 : i32 to index
    %c0_3 = arith.constant 0 : index
    %5 = vector.load %arg3[%c0_2, %4, %c0_3] : memref<1x64x16xbf16, #tpu.memory_space<vmem>>, vector<1x16x16xbf16>
    %6 = vector.shape_cast %5 : vector<1x16x16xbf16> to vector<16x16xbf16>
    %c0_4 = arith.constant 0 : index
    %c0_5 = arith.constant 0 : index
    %7 = vector.load %arg4[%c0_4, %c0_5] : memref<16x16xbf16, #tpu.memory_space<vmem>>, vector<16x16xbf16>
    %cst = arith.constant dense<0.000000e+00> : vector<16x16xf32>
    %8 = tpu.matmul %6, %7, %cst {dimension_numbers = #tpu.dot_dimension_numbers<[1], [0], [0], [1], [0, 0, 1, 1], [], []>} : vector<16x16xbf16>, vector<16x16xbf16>, vector<16x16xf32> -> vector<16x16xf32>
    %9 = arith.truncf %8 : vector<16x16xf32> to vector<16x16xbf16>
    %cst_6 = arith.constant dense<0.000000e+00> : vector<16x64xf32>
    %10 = tpu.matmul %9, %3, %cst_6 {dimension_numbers = #tpu.dot_dimension_numbers<[1], [1], [0], [0], [0, 0, 1, 0], [], []>} : vector<16x16xbf16>, vector<64x16xbf16>, vector<16x64xf32> -> vector<16x64xf32>
    %c0_7 = arith.constant 0 : index
    %c0_8 = arith.constant 0 : index
    %c0_9 = arith.constant 0 : index
    %11 = vector.load %arg2[%c0_7, %c0_8, %c0_9] : memref<1x1x64xf32, #tpu.memory_space<vmem>>, vector<1x1x64xf32>
    %12 = vector.shape_cast %11 : vector<1x1x64xf32> to vector<1x64xf32>
    %13 = vector.broadcast %12 : vector<1x64xf32> to vector<16x64xf32>
    %14 = arith.addf %10, %13 : vector<16x64xf32>
    %cst_10 = arith.constant dense<0xFF800000> : vector<16xf32>
    %15 = vector.multi_reduction <maximumf>, %14, %cst_10 [1] : vector<16x64xf32> to vector<16xf32>
    %16 = vector.shape_cast %15 : vector<16xf32> to vector<16x1xf32>
    %17 = vector.broadcast %16 : vector<16x1xf32> to vector<16x64xf32>
    %18 = arith.subf %14, %17 : vector<16x64xf32>
    %19 = math.exp %18 : vector<16x64xf32>
    %cst_11 = arith.constant dense<0.000000e+00> : vector<16xf32>
    %20 = vector.multi_reduction <add>, %19, %cst_11 [1] : vector<16x64xf32> to vector<16xf32>
    %21 = vector.shape_cast %20 : vector<16xf32> to vector<16x1xf32>
    %22 = tpu.reciprocal %21 {approx = true} : vector<16x1xf32> -> vector<16x1xf32>
    %23 = arith.truncf %19 : vector<16x64xf32> to vector<16x64xbf16>
    %cst_12 = arith.constant dense<0.000000e+00> : vector<16x16xf32>
    %24 = tpu.matmul %23, %3, %cst_12 {dimension_numbers = #tpu.dot_dimension_numbers<[1], [0], [0], [1], [0, 0, 1, 1], [], []>} : vector<16x64xbf16>, vector<64x16xbf16>, vector<16x16xf32> -> vector<16x16xf32>
    %25 = vector.broadcast %22 : vector<16x1xf32> to vector<16x16xf32>
    %26 = arith.mulf %24, %25 : vector<16x16xf32>
    %27 = arith.truncf %26 : vector<16x16xf32> to vector<16x16xbf16>
    %c0_13 = arith.constant 0 : index
    %c0_14 = arith.constant 0 : index
    %28 = vector.load %arg5[%c0_13, %c0_14] : memref<16x16xbf16, #tpu.memory_space<vmem>>, vector<16x16xbf16>
    %cst_15 = arith.constant dense<0.000000e+00> : vector<16x16xf32>
    %29 = tpu.matmul %27, %28, %cst_15 {dimension_numbers = #tpu.dot_dimension_numbers<[1], [0], [0], [1], [0, 0, 1, 1], [], []>} : vector<16x16xbf16>, vector<16x16xbf16>, vector<16x16xf32> -> vector<16x16xf32>
    %c0_16 = arith.constant 0 : index
    %c0_17 = arith.constant 0 : index
    %30 = vector.load %arg6[%c0_16, %c0_17] : memref<1x16xf32, #tpu.memory_space<vmem>>, vector<1x16xf32>
    %31 = vector.broadcast %30 : vector<1x16xf32> to vector<16x16xf32>
    %32 = arith.addf %29, %31 : vector<16x16xf32>
    %c0_18 = arith.constant 0 : index
    %c0_19 = arith.constant 0 : index
    %c0_20 = arith.constant 0 : index
    %33 = vector.load %arg7[%c0_18, %c0_19, %c0_20] : memref<1x16x16xf32, #tpu.memory_space<vmem>>, vector<1x16x16xf32>
    %34 = vector.shape_cast %33 : vector<1x16x16xf32> to vector<16x16xf32>
    %35 = vector.shape_cast %32 : vector<16x16xf32> to vector<1x16x16xf32>
    tpu.vector_store %arg7[%c0_18, %c0_19, %c0_20], %35 {strides = array<i32>} : memref<1x16x16xf32, #tpu.memory_space<vmem>>, vector<1x16x16xf32>,
    return
  }
  func.func @transform_0(%arg0: i32, %arg1: i32) -> (i32, i32, i32) {
    %c0_i32 = arith.constant 0 : i32
    %c0_i32_0 = arith.constant 0 : i32
    %c0_i32_1 = arith.constant 0 : i32
    return %arg0, %c0_i32, %c0_i32_0 : i32, i32, i32
  }
  func.func @transform_1(%arg0: i32, %arg1: i32) -> (i32, i32, i32) {
    %c0_i32 = arith.constant 0 : i32
    %c0_i32_0 = arith.constant 0 : i32
    %c0_i32_1 = arith.constant 0 : i32
    return %arg0, %c0_i32, %c0_i32_0 : i32, i32, i32
  }
  func.func @transform_2(%arg0: i32, %arg1: i32) -> (i32, i32) {
    %c0_i32 = arith.constant 0 : i32
    %c0_i32_0 = arith.constant 0 : i32
    %c0_i32_1 = arith.constant 0 : i32
    return %c0_i32, %c0_i32_0 : i32, i32
  }
  func.func @transform_3(%arg0: i32, %arg1: i32) -> (i32, i32) {
    %c0_i32 = arith.constant 0 : i32
    %c0_i32_0 = arith.constant 0 : i32
    %c0_i32_1 = arith.constant 0 : i32
    return %c0_i32, %c0_i32_0 : i32, i32
  }
  func.func @transform_4(%arg0: i32, %arg1: i32) -> (i32, i32) {
    %c0_i32 = arith.constant 0 : i32
    %c0_i32_0 = arith.constant 0 : i32
    %c0_i32_1 = arith.constant 0 : i32
    return %c0_i32, %c0_i32_0 : i32, i32
  }
  func.func @transform_5(%arg0: i32, %arg1: i32) -> (i32, i32, i32) {
    %c0_i32 = arith.constant 0 : i32
    %c0_i32_0 = arith.constant 0 : i32
    return %arg0, %arg1, %c0_i32 : i32, i32, i32
  }
}

</mosaic_0001>

<bundles_post_ra>
// kernel: tpu_custom_call.1
= control target key start
LH: loop header
LB: loop body
LE: loop exit
PB: predicated region body
PF: predicated region fallthrough
CT: control target
= control target key end

     0   :  { %s856_s18 = smov 0   ;;  %s858_s19 = smov 0   ;;  %s960_s0 = inlined_call_operand.vmem [shape: f32[2,1,64], index: 0, kind: input, shape index: {}]   ;;  %s961_s1 = inlined_call_operand.vmem [shape: bf16[2,64,16], index: 1, kind: input, shape index: {}]   ;;  %s962_s2 = inlined_call_operand.vmem [shape: bf16[16,16], index: 2, kind: input, shape index: {}]   ;;  %s963_s3 = inlined_call_operand.vmem [shape: bf16[16,16], index: 3, kind: input, shape index: {}]   ;;  %s964_s4 = inlined_call_operand.vmem [shape: f32[1,16], index: 4, kind: input, shape index: {}]   ;;  %s965_s5 = inlined_call_operand.vmem [shape: f32[2,64,16], index: 5, kind: output, shape index: {}]  }
   0x1   :  { %s860_s20 = smov 0   ;;  %s862_s21 = smov 0  }
   0x2   :  { %s864_s22 = smov 0  }
   0x3 LB: > { %s24_s23 = sadd.s32 1, %s814_s20  ;;  %s27_s24 = sadd.s32 1, %s818_s21  ;;  %s822_s22 = sphi %s864_s22, %s15_s22   ;;  %s818_s21 = sphi %s862_s21, %s969_s21   ;;  %s814_s20 = sphi %s860_s20, %s968_s20   ;;  %s810_s19 = sphi %s858_s19, %s967_s19   ;;  %s806_s18 = sphi %s856_s18, %s966_s18  }
   0x4   : > { %p25_p0 = scmp.ge.s32.totalorder %s24_s23, 4  ;;  %p653_p1 = scmp.ge.s32.totalorder %s822_s22, 1 }
   0x5   : > { %p209_p2 = scmp.lt.s32.totalorder %s822_s22, 9 }
   0x6   : > { %s971_s23 = smov (%p25_p0, %s24_s23), 0  ;;  %s973_s24 = smov (!%p25_p0, %s27_s24), %s818_s21 }
   0x7   : > { %p210_p3 = pnand %p653_p1, %p209_p2  ;;  %p29_p4 = scmp.ge.s32.totalorder %s973_s24, 2 }
   0x8   : > { %v769_v0 = vld [vmem:[%s962_s2] sm:$0xff] (!%p210_p3)   ;;  %v824_v1 = vmov (!%p210_p3), 0.0   ;;  %p244_p5 = scmp.lt.s32.totalorder (!%p210_p3), %s810_s19, 1  ;;  %s659_s27 = sshll.u32 (!%p210_p3), %s806_s18, 4  ;;  %vm825_vm0 = vmmov (!%p210_p3), 0   ;;  %vm291_vm1 = vcmask (!%p210_p3), 130048  }
   0x9   : > { %s975_s24 = smov (%p29_p4, %s973_s24), 0  ;;  %213 = sbr.rel (%p210_p3) target bundleno = 1050 (0x41a), region = 40 }
   0xa   : > { %691 = vmatprep.subr.bf16.mxu0 (!%p210_p3), %v824_v1  ;;  %697 = vmatprep.subr.bf16.mxu1 (!%p210_p3), %v824_v1  ;;  %s272_s28 = sshra.s32 (!%p210_p3), %s659_s27, 3  ;;  %vm420_vm2 = vcmask (!%p210_p3), 523264   ;;  %v775_v36 = vld [vmem:[%s963_s3] sm:$0xff] (!%p210_p3)   ;;  %s656_s15 = sshll.u32 (!%p210_p3), %s806_s18, 1 }
   0xb   : > { %692 = vmatpush3.bf16.msra.mxu0 (!%p210_p3), %v769_v0  ;;  %693 = vmatprep.mubr.msk.bf16.mxu0 (!%p210_p3), %vm825_vm0, %v824_v1  ;;  %s660_s29 = sshll.u32 (!%p210_p3), %s272_s28, 2  ;;  %p255_p6 = scmp.lt.s32.totalorder (!%p210_p3), %s656_s15, 7  ;;  %v671_v48 = vld [vmem:[%s964_s4] ss:$0 sm:$0xff] (!%p210_p3) }
   0xc   : > { %705 = vmatprep.mubr.msk.bf16.mxu1 (!%p210_p3), %vm825_vm0, %v824_v1  ;;  %709 = vmatprep.subr.bf16.mxu0 (!%p210_p3), %v824_v1 }
  0x10   : > { %s977_s19 = smov (!%p244_p5, %s810_s19), 1  ;;  %s979_s15 = smov (!%p255_p6, %s656_s15), 7 }
  0x11   : > { %s676_s30 = sshll.u32 %s977_s19, 5  ;;  %s246_s12 = scalar_lea.vmem %s960_s0, %s977_s19 }
  0x12   : > { %s251_s8 = scalar_lea.vmem %s961_s1, %s676_s30  ;;  %v664_v16 = vld [vmem:[%s246_s12] ss:$0 sm:$0xff]  ;;  %s657_s16 = sshll.u32 %s977_s19, 3 }
  0x13   : > { %s275_s9 = scalar_lea.vmem %s251_s8, %s660_s29  ;;  %v771_v2 = vld [vmem:[%s251_s8] sm:$0xff]   ;;  %v772_v5 = vld [vmem:[%s251_s8 + $0x8] sm:$0xff]   ;;  %v773_v7 = vld [vmem:[%s251_s8 + $0x10] sm:$0xff]   ;;  %s258_s17 = sadd.s32 %s657_s16, %s979_s15 }
  0x14   : > { %v770_v3 = vld [vmem:[%s275_s9] sm:$0xff]   ;;  %v368_v4 = vsel %vm291_vm1, %v771_v2, 0  ;;  %v371_v6 = vsel %vm291_vm1, %v772_v5, 0  ;;  %v774_v8 = vld [vmem:[%s251_s8 + $0x18] sm:$0xff]   ;;  %v374_v9 = vsel %vm291_vm1, %v773_v7, 0  ;;  %s658_s25 = sshll.u32 %s258_s17, 3 }
  0x15   : > { %694 = vmatmul.mubr.msk.bf16.vlgmr.msra.gmra.mrb[0].mxu0 %vm291_vm1, %v770_v3  ;;  %698 = vmatpush3.bf16.xpose.msra.mxu1 %v368_v4  ;;  %v377_v10 = vsel %vm291_vm1, %v774_v8, 0  ;;  %s260_s30 = scalar_lea.vmem %s965_s5, %s658_s25 }
  0x16   : > { %699 = vmatprep.subr.bf16.mxu1 %v824_v1  ;;  %710 = vmatpush3.bf16.msra.mxu0 %v771_v2 }
  0x17   : > { %711 = vmatprep.subr.bf16.mxu0 %v824_v1  ;;  %717 = vmatprep.mubr.msk.bf16.mxu0 %vm825_vm0, %v824_v1 }
  0x1a   : > { %712 = vmatpush3.bf16.msra.mxu0 %v772_v5 }
  0x1b   : > { %713 = vmatprep.subr.bf16.mxu0 %v824_v1 }
  0x1d   : > { %700 = vmatpush3.bf16.xpose.msra.mxu1 %v371_v6 }
  0x1e   : > { %701 = vmatprep.subr.bf16.mxu1 %v824_v1  ;;  %714 = vmatpush3.bf16.msra.mxu0 %v773_v7 }
  0x1f   : > { %715 = vmatprep.subr.bf16.mxu0 %v824_v1 }
  0x22   : > { %716 = vmatpush3.bf16.msra.mxu0 %v774_v8 }
  0x23   : > { %721 = vmatprep.subr.bf16.mxu0 %v824_v1 }
  0x25   : > { %702 = vmatpush3.bf16.xpose.msra.mxu1 %v374_v9 }
  0x26   : > { %703 = vmatprep.subr.bf16.mxu1 %v824_v1 }
  0x2d   : > { %704 = vmatpush3.bf16.xpose.msra.mxu1 %v377_v10 }
  0xe8   : > { %v329_v11 = vpop.f32.mrb[0].mxu0 }
  0xe9   : > { %v695_v12 = vpop.f32.mrb[1].mxu0 }
  0xea   : > { %v332_v13 = vpop.f32.mrb[2].mxu0 }
  0xeb   : > { %v336_v14 = vpack.c.bf16 %v332_v13, %v329_v11  ;;  %v696_v15 = vpop.f32.mrb[3].mxu0 }
  0xed   : > { %706 = vmatmul.mubr.msk.bf16.vlgmr.msra.gmra.mrb[0].mxu1 %vm291_vm1, %v336_v14 }
 0x1c0   : > { %v413_v17 = vpop.f32.mrb[0].mxu1 }
 0x1c1   : > { %v414_v18 = vadd.f32 %v664_v16, %v413_v17  ;;  %v707_v19 = vpop.f32.mrb[1].mxu1 }
 0x1c2   : > { %v416_v20 = vpop.f32.mrb[2].mxu1 }
 0x1c3   : > { %v417_v21 = vadd.f32 %v664_v16, %v416_v20  ;;  %v708_v22 = vpop.f32.mrb[3].mxu1  ;;  %v421_v23 = vsel %vm420_vm2, %v414_v18, -inf }
 0x1c4   : > { %422 = vmax.xlane.f32.xlu0 %v421_v23 }
 0x1c5   : > { %v424_v24 = vsel %vm420_vm2, %v417_v21, -inf }
 0x1c8   : > { %425 = vmax.xlane.f32.xlu0 %v424_v24 }
 0x251   : > { %v423_v25 = vpop.xlane.xlu0 %422 }
 0x252   : > { %v427_v26 = vsub.f32 %v414_v18, %v423_v25 }
 0x254   : > { %v429_v27 = vmul.f32 1.442695, %v427_v26 }
 0x255   : > { %v426_v28 = vpop.xlane.xlu0 %425 }
 0x256   : > { %776 = vpow2.f32 %v429_v27  ;;  %v428_v29 = vsub.f32 %v417_v21, %v426_v28 }
 0x258   : > { %v431_v30 = vmul.f32 1.442695, %v428_v29 }
 0x25a   : > { %778 = vpow2.f32 %v431_v30 }
 0x260   : > { %v777_v31 = vpop.eup %776 }
 0x261   : > { %v433_v32 = vsel %vm420_vm2, %v777_v31, 0.0 }
 0x262   : > { %434 = vadd.xlane.f32.xlu1 %v433_v32 }
 0x264   : > { %v779_v33 = vpop.eup %778 }
 0x265   : > { %v436_v34 = vsel %vm420_vm2, %v779_v33, 0.0  ;;  %v441_v35 = vpack.c.bf16 %v779_v33, %v777_v31 }
 0x266   : > { %437 = vadd.xlane.f32.xlu1 %v436_v34 }
 0x267   : > { %718 = vmatmul.mubr.msk.bf16.vlgmr.msra.gmra.mrb[4].mxu0 %vm420_vm2, %v441_v35 }
 0x268   : > { %723 = vmatprep.mubr.msk.bf16.mxu0 %vm825_vm0, %v824_v1  ;;  %722 = vmatpush3.bf16.msra.mxu0 %v775_v36 }
 0x2ef   : > { %v435_v37 = vpop.xlane.xlu1 %434 }
 0x2f0   : > { %780 = vrcp.f32 %v435_v37 }
 0x2f3   : > { %v438_v38 = vpop.xlane.xlu1 %437 }
 0x2f4   : > { %782 = vrcp.f32 %v438_v38 }
 0x2fa   : > { %v781_v40 = vpop.eup %780 }
 0x2fe   : > { %v783_v42 = vpop.eup %782 }
 0x33a   : > { %v483_v39 = vpop.f32.mrb[4].mxu0 }
 0x33b   : > { %v719_v41 = vpop.f32.mrb[5].mxu0  ;;  %v490_v44 = vmul.f32 %v781_v40, %v483_v39 }
 0x33c   : > { %v486_v43 = vpop.f32.mrb[6].mxu0 }
 0x33d   : > { %v491_v45 = vmul.f32 %v783_v42, %v486_v43  ;;  %v720_v46 = vpop.f32.mrb[7].mxu0 }
 0x33f   : > { %v492_v47 = vpack.c.bf16 %v491_v45, %v490_v44 }
 0x341   : > { %724 = vmatmul.mubr.msk.bf16.vlgmr.msra.gmra.mrb[8].mxu0 %vm291_vm1, %v492_v47 }
 0x414   : > { %v545_v49 = vpop.f32.mrb[8].mxu0 }
 0x415   : > { %v546_v50 = vadd.f32 %v671_v48, %v545_v49  ;;  %v725_v51 = vpop.f32.mrb[9].mxu0 }
 0x416   : > { %v548_v52 = vpop.f32.mrb[10].mxu0 }
 0x417   : > { %552 = vst.msk [vmem:[%s260_s30] sm:$0xff] %vm291_vm1, %v546_v50  ;;  %v549_v53 = vadd.f32 %v671_v48, %v548_v52  ;;  %v726_v54 = vpop.f32.mrb[11].mxu0 }
 0x419   : > { %553 = vst.msk [vmem:[%s260_s30 + $0x8] sm:$0xff] %vm291_vm1, %v549_v53 }
 0x41a PF: > { %s15_s22 = sadd.s32 1, %s822_s22   ;;  %s966_s18 = smov %s814_s20 }
 0x41b   : > { %p12_p7 = scmp.ge.s32.totalorder %s15_s22, 10   ;;  %s967_s19 = smov %s818_s21 }
 0x41c   : > { %s968_s20 = smov %s971_s23  ;;  %s969_s21 = smov %s975_s24 }
 0x41d   :  { %14 = sbr.rel (!%p12_p7) target bundleno = 3 (0x3), region = 74 }

</bundles_post_ra>
